<compile_context>
chip_gen: v7x
topology: tpu7x:2x2x1
jax: 0.10.0
libtpu: 0.0.40
codegen_flags: <defaults>
</compile_context>

<pallas_src>
import jax
import jax.numpy as jnp
from jax.experimental import pallas as pl
from jax.experimental.pallas import tpu as pltpu


def _head_kernel(x_ref, w_ref, b_ref, o_ref, acc_ref):
    # x_ref:   (bm, C, hw_tile)  native dtype; HW on lanes, full C on sublanes
    # w_ref:   (C, n_pad)        weight.T * (1/HW), VMEM-resident across the grid
    # b_ref:   (1, n_pad)        f32 bias, VMEM-resident
    # o_ref:   (bm, n_pad)       resident across the HW-reduction axis
    # acc_ref: (bm, C)           f32 scratch accumulator (partial HW sums)
    k = pl.program_id(1)

    @pl.when(k == 0)
    def _():
        acc_ref[...] = jnp.zeros_like(acc_ref)

    # Partial global-average-pool: sum this HW tile in f32 (cross-lane reduce).
    acc_ref[...] += jnp.sum(x_ref[...].astype(jnp.float32), axis=-1)  # (bm, C)

    @pl.when(k == pl.num_programs(1) - 1)
    def _():
        # 1/HW is folded into w_ref at trace time, so acc feeds the MXU directly.
        pooled = acc_ref[...].astype(w_ref.dtype)
        logits = jnp.dot(pooled, w_ref[...],
                         preferred_element_type=jnp.float32) + b_ref[...]
        o_ref[...] = jax.nn.sigmoid(logits).astype(o_ref.dtype)


def _valid_bms(B):
    # Output block is (bm, n_pad): bm must equal B or be a multiple of 8 dividing B.
    vals = {B}
    for t in range(8, B, 8):
        if B % t == 0:
            vals.add(t)
    return sorted(vals, reverse=True)


def _valid_hw_tiles(HW):
    # x block is (bm, C, hw_tile): hw_tile must equal HW or be a multiple of 128 dividing HW.
    vals = {HW}
    for t in range(128, HW, 128):
        if HW % t == 0:
            vals.add(t)
    return sorted(vals, reverse=True)


def _pick_tiles(B, C, HW, n_pad, x_itemsize, w_itemsize, budget):
    bms = _valid_bms(B)
    hws = _valid_hw_tiles(HW)

    def cost(bm, hw):
        x_bytes = bm * C * hw * x_itemsize
        f32_tmp = bm * C * hw * 4 if x_itemsize < 4 else 0   # upcast temporary
        return (2 * x_bytes + f32_tmp                        # double-buffered x + cast temp
                + 2 * C * n_pad * w_itemsize                 # resident weight (x2 buffers)
                + 2 * n_pad * 4                              # resident bias
                + 2 * bm * n_pad * 4                         # output block
                + bm * C * 4)                                # f32 accumulator scratch

    # Keep hw_tile as large as possible; shrink bm first.
    for hw in hws:
        fitting = [bm for bm in bms if cost(bm, hw) <= budget]
        if not fitting:
            continue
        # Prefer >=2 B tiles so both v7x TensorCores get work.
        multi = [bm for bm in fitting if B // bm >= 2]
        return (max(multi) if multi else max(fitting)), hw
    # Nothing fits the soft budget: smallest legal block, rely on raised vmem limit.
    # TODO(synk): masked partial lane tiles (pl.cdiv grid) for pathological HW with
    # no multiple-of-128 divisor and a very large full-HW block.
    return min(bms), min(hws)


def classification_head(x_nchw, weight_t, bias, *, bm=None, hw_tile=None):
    """x_nchw: [B, C, H, W]; weight_t: [C, NUM_CLASSES] (PyTorch weight.T); bias: [NUM_CLASSES]."""
    B, C, H, W = x_nchw.shape
    HW = H * W
    num_classes = weight_t.shape[1]
    n_pad = ((num_classes + 127) // 128) * 128           # lane-dense output width

    # Native layout: NCHW -> (B, C, HW) is a free reshape; no transpose, so x is
    # streamed from HBM exactly once, in its native dtype.
    x3 = x_nchw.reshape(B, C, HW)
    x_itemsize = x3.dtype.itemsize

    # Fold 1/HW into the (tiny) weight at trace time; bf16 weights for bf16 inputs.
    w_dtype = jnp.bfloat16 if x3.dtype == jnp.bfloat16 else jnp.float32
    inv_hw = 1.0 / float(HW)
    w_pad = jnp.zeros((C, n_pad), w_dtype).at[:, :num_classes].set(
        (weight_t.astype(jnp.float32) * inv_hw).astype(w_dtype))
    b_pad = jnp.zeros((1, n_pad), jnp.float32).at[:, :num_classes].set(
        bias.astype(jnp.float32).reshape(1, num_classes))
    w_itemsize = w_pad.dtype.itemsize

    # Generation-aware VMEM budget (v7x: 64 MiB/TC; v5e/v6e: 128 MiB physical but
    # small default scoped limits -> raise vmem_limit_bytes explicitly).
    try:
        vmem_cap = int(pltpu.get_tpu_info().vmem_capacity_bytes)
    except Exception:
        vmem_cap = 64 * 1024 * 1024                       # conservative (v7x per-core)
    budget = min(int(vmem_cap * 0.6), 48 * 1024 * 1024)
    vmem_limit = min(int(vmem_cap * 0.75), 100 * 1024 * 1024)

    if bm is None or hw_tile is None:
        auto_bm, auto_hw = _pick_tiles(B, C, HW, n_pad, x_itemsize, w_itemsize, budget)
        bm = auto_bm if bm is None else bm
        hw_tile = auto_hw if hw_tile is None else hw_tile
    assert B % bm == 0 and (bm == B or bm % 8 == 0), (B, bm)
    assert HW % hw_tile == 0 and (hw_tile == HW or hw_tile % 128 == 0), (HW, hw_tile)

    grid = (B // bm, HW // hw_tile)
    hw_steps = grid[1]

    # Deeper x pipelining when blocks are small and the reduction is long (v7x HBM).
    x_block_bytes = bm * C * hw_tile * x_itemsize
    if hw_steps >= 4 and x_block_bytes <= (1 << 20):
        x_spec = pl.BlockSpec((bm, C, hw_tile), lambda b, k: (b, 0, k),
                              pipeline_mode=pl.Buffered(3))
    else:
        x_spec = pl.BlockSpec((bm, C, hw_tile), lambda b, k: (b, 0, k))

    cost = pl.CostEstimate(
        flops=int(B * C * HW + 2 * B * C * n_pad),
        transcendentals=int(B * n_pad),
        bytes_accessed=int(x3.size * x_itemsize + w_pad.size * w_itemsize
                           + b_pad.size * 4 + B * n_pad * 4),
    )

    out = pl.pallas_call(
        _head_kernel,
        out_shape=jax.ShapeDtypeStruct((B, n_pad), x3.dtype),
        grid_spec=pltpu.PrefetchScalarGridSpec(
            num_scalar_prefetch=0,
            grid=grid,
            in_specs=[
                x_spec,
                pl.BlockSpec((C, n_pad), lambda b, k: (0, 0)),
                pl.BlockSpec((1, n_pad), lambda b, k: (0, 0)),
            ],
            out_specs=pl.BlockSpec((bm, n_pad), lambda b, k: (b, 0)),
            scratch_shapes=[pltpu.VMEM((bm, C), jnp.float32)],
        ),
        compiler_params=pltpu.CompilerParams(
            dimension_semantics=("parallel", "arbitrary"),
            vmem_limit_bytes=vmem_limit),
        cost_estimate=cost,
    )(x3, w_pad, b_pad)

    return out[:, :num_classes]


if __name__ == "__main__":
    B, C, H, W = 2, 4, 16, 16
    NUM_CLASSES = 5

    key = jax.random.PRNGKey(0)
    kx, kw, kb = jax.random.split(key, 3)

    x = jax.random.normal(kx, (B, C, H, W), dtype=jnp.float32)
    # PyTorch nn.Linear(in_channels, num_classes): weight [NUM_CLASSES, C], bias [NUM_CLASSES]
    bound = 1.0 / (C ** 0.5)
    w_pt = jax.random.uniform(kw, (NUM_CLASSES, C), minval=-bound, maxval=bound,
                              dtype=jnp.float32)
    b_pt = jax.random.uniform(kb, (NUM_CLASSES,), minval=-bound, maxval=bound,
                              dtype=jnp.float32)

    # hw_tile=128 (HW=256) exercises the multi-step HW-reduction pipeline.
    out = classification_head(x, w_pt.T, b_pt, hw_tile=128)
    out = jax.block_until_ready(out)

    # Pure-JAX reference (same semantics as the PyTorch module).
    pooled_ref = jnp.mean(x, axis=(2, 3))                       # (B, C)
    ref = jax.nn.sigmoid(pooled_ref @ w_pt.T + b_pt)            # (B, NUM_CLASSES)
    assert out.shape == (B, NUM_CLASSES)
    assert jnp.allclose(out, ref, atol=1e-5, rtol=1e-5), float(jnp.max(jnp.abs(out - ref)))

    print("KERNEL_OK")
</pallas_src>

<mosaic_0001>
module attributes {stable_mosaic.version = 11 : i64} {
  func.func @_head_kernel(%arg0: i32, %arg1: i32, %arg2: memref<2x4x128xf32, #tpu.memory_space<vmem>>, %arg3: memref<4x128xf32, #tpu.memory_space<vmem>>, %arg4: memref<1x128xf32, #tpu.memory_space<vmem>>, %arg5: memref<2x128xf32, #tpu.memory_space<vmem>>, %arg6: memref<2x4xf32, #tpu.memory_space<vmem>>) attributes {dimension_semantics = [#tpu.dimension_semantics<parallel>, #tpu.dimension_semantics<arbitrary>], iteration_bounds = array<i64: 1, 2>, scalar_prefetch = 0 : i64, scratch_operands = 1 : i64, tpu.core_type = #tpu.core_type<tc>, window_params = [{transform_indices = @transform_0, window_bounds = array<i64: 2, 4, 128>}, {pipeline_mode = #tpu.pipeline_mode<synchronous>, transform_indices = @transform_1, window_bounds = array<i64: 4, 128>}, {pipeline_mode = #tpu.pipeline_mode<synchronous>, transform_indices = @transform_2, window_bounds = array<i64: 1, 128>}, {transform_indices = @transform_3, window_bounds = array<i64: 2, 128>}]} {
    %c0_i32 = arith.constant 0 : i32
    %0 = arith.cmpi eq, %arg1, %c0_i32 : i32
    %1 = arith.extui %0 : i1 to i32
    %c0_i32_0 = arith.constant 0 : i32
    %2 = arith.cmpi ne, %1, %c0_i32_0 : i32
    scf.if %2 {
      %cst_8 = arith.constant 0.000000e+00 : f32
      %11 = vector.broadcast %cst_8 : f32 to vector<2x4xf32>
      %c0_9 = arith.constant 0 : index
      %c0_10 = arith.constant 0 : index
      %12 = vector.load %arg6[%c0_9, %c0_10] : memref<2x4xf32, #tpu.memory_space<vmem>>, vector<2x4xf32>
      tpu.vector_store %arg6[%c0_9, %c0_10], %11 {strides = array<i32>} : memref<2x4xf32, #tpu.memory_space<vmem>>, vector<2x4xf32>,
    } else {
    }
    %c0 = arith.constant 0 : index
    %c0_1 = arith.constant 0 : index
    %3 = vector.load %arg6[%c0, %c0_1] : memref<2x4xf32, #tpu.memory_space<vmem>>, vector<2x4xf32>
    %c0_2 = arith.constant 0 : index
    %c0_3 = arith.constant 0 : index
    %c0_4 = arith.constant 0 : index
    %4 = vector.load %arg2[%c0_2, %c0_3, %c0_4] : memref<2x4x128xf32, #tpu.memory_space<vmem>>, vector<2x4x128xf32>
    %cst = arith.constant dense<0.000000e+00> : vector<2x4xf32>
    %5 = vector.multi_reduction <add>, %4, %cst [2] : vector<2x4x128xf32> to vector<2x4xf32>
    %6 = arith.addf %3, %5 : vector<2x4xf32>
    %c0_5 = arith.constant 0 : index
    %c0_6 = arith.constant 0 : index
    %7 = vector.load %arg6[%c0_5, %c0_6] : memref<2x4xf32, #tpu.memory_space<vmem>>, vector<2x4xf32>
    tpu.vector_store %arg6[%c0_5, %c0_6], %6 {strides = array<i32>} : memref<2x4xf32, #tpu.memory_space<vmem>>, vector<2x4xf32>,
    %c1_i32 = arith.constant 1 : i32
    %8 = arith.cmpi eq, %arg1, %c1_i32 : i32
    %9 = arith.extui %8 : i1 to i32
    %c0_i32_7 = arith.constant 0 : i32
    %10 = arith.cmpi ne, %9, %c0_i32_7 : i32
    scf.if %10 {
      %c0_8 = arith.constant 0 : index
      %c0_9 = arith.constant 0 : index
      %11 = vector.load %arg6[%c0_8, %c0_9] : memref<2x4xf32, #tpu.memory_space<vmem>>, vector<2x4xf32>
      %c0_10 = arith.constant 0 : index
      %c0_11 = arith.constant 0 : index
      %12 = vector.load %arg3[%c0_10, %c0_11] : memref<4x128xf32, #tpu.memory_space<vmem>>, vector<4x128xf32>
      %cst_12 = arith.constant dense<0.000000e+00> : vector<2x128xf32>
      %13 = tpu.matmul %11, %12, %cst_12 {dimension_numbers = #tpu.dot_dimension_numbers<[1], [0], [0], [1], [0, 0, 1, 1], [], []>} : vector<2x4xf32>, vector<4x128xf32>, vector<2x128xf32> -> vector<2x128xf32>
      %c0_13 = arith.constant 0 : index
      %c0_14 = arith.constant 0 : index
      %14 = vector.load %arg4[%c0_13, %c0_14] : memref<1x128xf32, #tpu.memory_space<vmem>>, vector<1x128xf32>
      %15 = vector.broadcast %14 : vector<1x128xf32> to vector<2x128xf32>
      %16 = arith.addf %13, %15 : vector<2x128xf32>
      %17 = arith.negf %16 : vector<2x128xf32>
      %18 = math.exp %17 : vector<2x128xf32>
      %cst_15 = arith.constant 1.000000e+00 : f32
      %19 = vector.broadcast %cst_15 : f32 to vector<2x128xf32>
      %20 = arith.addf %19, %18 : vector<2x128xf32>
      %21 = arith.divf %19, %20 : vector<2x128xf32>
      %c0_16 = arith.constant 0 : index
      %c0_17 = arith.constant 0 : index
      %22 = vector.load %arg5[%c0_16, %c0_17] : memref<2x128xf32, #tpu.memory_space<vmem>>, vector<2x128xf32>
      tpu.vector_store %arg5[%c0_16, %c0_17], %21 {strides = array<i32>} : memref<2x128xf32, #tpu.memory_space<vmem>>, vector<2x128xf32>,
    } else {
    }
    return
  }
  func.func @transform_0(%arg0: i32, %arg1: i32) -> (i32, i32, i32) {
    %c0_i32 = arith.constant 0 : i32
    %c0_i32_0 = arith.constant 0 : i32
    return %arg0, %c0_i32, %arg1 : i32, i32, i32
  }
  func.func @transform_1(%arg0: i32, %arg1: i32) -> (i32, i32) {
    %c0_i32 = arith.constant 0 : i32
    %c0_i32_0 = arith.constant 0 : i32
    %c0_i32_1 = arith.constant 0 : i32
    return %c0_i32, %c0_i32_0 : i32, i32
  }
  func.func @transform_2(%arg0: i32, %arg1: i32) -> (i32, i32) {
    %c0_i32 = arith.constant 0 : i32
    %c0_i32_0 = arith.constant 0 : i32
    %c0_i32_1 = arith.constant 0 : i32
    return %c0_i32, %c0_i32_0 : i32, i32
  }
  func.func @transform_3(%arg0: i32, %arg1: i32) -> (i32, i32) {
    %c0_i32 = arith.constant 0 : i32
    %c0_i32_0 = arith.constant 0 : i32
    return %arg0, %c0_i32 : i32, i32
  }
}

</mosaic_0001>

<bundles_post_ra>
// kernel: tpu_custom_call.1
= control target key start
LH: loop header
LB: loop body
LE: loop exit
PB: predicated region body
PF: predicated region fallthrough
CT: control target
= control target key end

     0   :  { %8 = vsyncpa [#allocation4], 0  ;;  %s904_s0 = inlined_call_operand.hbm [shape: f32[2,4,256], index: 0, kind: input, shape index: {}]   ;;  %s905_s1 = inlined_call_operand.hbm [shape: f32[4,128], index: 1, kind: input, shape index: {}]   ;;  %s906_s2 = inlined_call_operand.vmem [shape: f32[1,128], index: 2, kind: input, shape index: {}]   ;;  %s907_s3 = inlined_call_operand.hbm [shape: f32[2,128], index: 3, kind: output, shape index: {}]  }
   0x1   :  { %10 = vsyncpa [#allocation4 + $0x1], 0 }
   0x2   :  { %11 = vsyncpa [#allocation7], 0 }
   0x3   :  { %12 = vsyncpa [#allocation5], 0  ;;  %s707_s12 = smov 0   ;;  %s709_s13 = smov 0  }
   0x4   :  { %s711_s14 = smov 0   ;;  %s713_s15 = smov 0  }
   0x5   :  { %s715_s16 = smov 0   ;;  %s717_s17 = smov 0  }
   0x6 LB: > { %s425_s18 = sadd.s32 4294967295, %s676_s17   ;;  %s39_s19 = sadd.s32 1, %s664_s14  ;;  %s676_s17 = sphi %s717_s17, %s18_s17   ;;  %s672_s16 = sphi %s715_s16, %s927_s16   ;;  %s668_s15 = sphi %s713_s15, %s926_s15   ;;  %s664_s14 = sphi %s711_s14, %s925_s14   ;;  %s660_s13 = sphi %s709_s13, %s924_s13   ;;  %s656_s12 = sphi %s707_s12, %s923_s12  }
   0x7   : > { %p46_p0 = scmp.ne.s32.totalorder %s664_s14, %s660_s13  ;;  %p47_p1 = scmp.eq.s32.totalorder %s676_s17, 0 }
   0x8   : > { %p52_p2 = scmp.ne.s32.totalorder %s660_s13, %s656_s12  ;;  %p743_p3 = scmp.eq.s32.totalorder %s425_s18, 0 }
   0x9   : > { %p48_p4 = por %p47_p1, %p46_p0  ;;  %p426_p5 = scmp.ge.s32.totalorder %s676_s17, 1 }
   0xa   : > { %s913_s20 = scalar_select %p743_p3, 1, 0 }
   0xb   : > { %p750_p6 = por %p743_p3, %p52_p2  ;;  %p131_p7 = scmp.lt.s32.totalorder %s676_s17, 3 }
   0xc   : > { %s678_s23 = smov [#allocation6]   ;;  %p470_p10 = scmp.lt.s32.totalorder %s676_s17, 2 }
   0xd   : > { %s914_s21 = scalar_select %p750_p6, 1, 0 }
   0xe   : > { %p755_p8 = pnand %p426_p5, %p131_p7  ;;  %s144_s24 = sshll.u32 %s678_s23, 4  ;;  %s145_s24 = int_to_ptr.vmem [resolvable:$true] %s144_s24 }
   0xf   : > { %s158_s25 = sand.u32 1, %s664_s14   ;;  %p769_p12 = pnand %p470_p10, %p48_p4 }
  0x10   : > { %s915_s22 = scalar_select %p755_p8, 1, 0 }
  0x11   : > { %p461_p9 = pneg %p755_p8  ;;  %s534_s30 = scalar_lea.hbm %s905_s1, 64 }
  0x12   : > { %s917_s27 = scalar_select %p769_p12, 1, 0 }
  0x13   : > { %p765_p11 = pnand %p461_p9, %p743_p3  ;;  %p535_p13 = scmp.ne.s32.totalorder %s905_s1, %s534_s30 }
  0x14   : > { %p541_p5 = scmp.lt.u32.totalorder %s534_s30, %s905_s1 }
  0x15   : > { %p536_p0 = pneg %p765_p11 }
  0x17   : > { %p537_p1 = pnand %p536_p0, %p535_p13 }
  0x19   : > { %p538_p2 = pneg %p537_p1 }
  0x1b   : > { %p543_p4 = pnand %p541_p5, %p538_p2 }
  0x1d   : > { %546 = shalt.err (!%p543_p4)
}
  0x1e   : > { %s547_s8 = scalar_lea.vmem %s145_s24, 64  ;;  %p555_p3 = scmp.lt.s32.totalorder %s145_s24, %s145_s24 }
  0x1f   : > { %p548_p7 = scmp.ne.s32.totalorder %s145_s24, %s547_s8  ;;  %p556_p6 = scmp.lt.s32.totalorder %s547_s8, %s547_s8 }
  0x21   : > { %p550_p9 = pnand %p548_p7, %p536_p0  ;;  %p557_p8 = por %p556_p6, %p555_p3 }
  0x23   : > { %p551_p10 = pneg %p550_p9 }
  0x25   : > { %p558_p12 = pnand %p557_p8, %p551_p10 }
  0x27   : > { %561 = shalt.err (!%p558_p12)
}
  0x28   : > { %464 = dma.hbm_to_vmem [thread:$0]  (!%p765_p11), %s905_s1, 64, %s145_s24, [#allocation7]  }
  0x29   : > { %s27_s11 = sadd.s32 1, %s672_s16  ;;  %s429_s12 = sshll.u32 %s158_s25, 3 }
  0x2a   : > { %p28_p3 = scmp.ge.s32.totalorder %s27_s11, 2  ;;  %s430_s23 = sshll.u32 %s672_s16, 6 }
  0x2b   : > { %s162_s28 = scalar_lea.vmem [#allocation3], %s429_s12  ;;  %s798_s4 = scalar_lea.hbm %s904_s0, %s430_s23 }
  0x2c   : > { %s171_s26 = sshll.u32 %s162_s28, 4  ;;  %s929_s11 = smov (%p28_p3, %s27_s11), 0  ;;  %s800_s26 = int_to_ptr.vmem [resolvable:$true] %s171_s26 }
  0x2d   : > { %s35_s24 = ssub.s32 %s672_s16, %s929_s11  ;;  %s811_s6 = scalar_lea.sflag [#allocation4], %s158_s25 }
  0x2e   : > { %p37_p6 = scmp.eq.s32.totalorder %s35_s24, 0  ;;  %s562_s7 = scalar_lea.hbm %s798_s4, 128 }
  0x2f   : > { %p563_p8 = scmp.ne.s32.totalorder %s798_s4, %s562_s7  ;;  %p918_p11 = scmp.ne.s32.totalorder %s917_s27, 0 }
  0x30   : > { %s807_s5 = scalar_select %p37_p6, %s664_s14, %s39_s19  }
  0x31   : > { %p564_p12 = pneg %p918_p11  ;;  %s567_s10 = scalar_lea.hbm %s904_s0, 256 }
  0x32   : > { %p568_p1 = scmp.lt.u32.totalorder %s798_s4, %s904_s0  ;;  %p569_p2 = scmp.lt.u32.totalorder %s567_s10, %s562_s7 }
  0x33   : > { %p565_p13 = pnand %p564_p12, %p563_p8  ;;  %p571_p4 = scmp.lt.u32.totalorder %s562_s7, %s798_s4 }
  0x34   : > { %p570_p5 = por %p569_p2, %p568_p1 }
  0x35   : > { %p566_p0 = pneg %p565_p13 }
  0x36   : > { %p572_p7 = por %p571_p4, %p570_p5 }
  0x38   : > { %p573_p9 = pnand %p572_p7, %p566_p0 }
  0x3a   : > { %576 = shalt.err (!%p573_p9)
}
  0x3b   : > { %s577_s19 = scalar_lea.vmem %s800_s26, 128  ;;  %s679_s25 = smov [#allocation3]  }
  0x3c   : > { %p578_p10 = scmp.ne.s32.totalorder %s800_s26, %s577_s19  ;;  %s582_s28 = sshll.u32 %s679_s25, 4  ;;  %s583_s28 = int_to_ptr.vmem [resolvable:$false] %s582_s28 }
  0x3d   : > { %s584_s29 = scalar_lea.vmem %s583_s28, 256  ;;  %p585_p8 = scmp.lt.s32.totalorder %s800_s26, %s583_s28 }
  0x3e   : > { %p580_p3 = pnand %p578_p10, %p564_p12  ;;  %p586_p13 = scmp.lt.s32.totalorder %s584_s29, %s577_s19 }
  0x40   : > { %p581_p6 = pneg %p580_p3  ;;  %p587_p1 = por %p586_p13, %p585_p8 }
  0x42   : > { %p588_p2 = pnand %p587_p1, %p581_p6 }
  0x44   : > { %591 = shalt.err (!%p588_p2)
}
  0x45   : > { %s680_s30 = smov 128   ;;  %s681_s24 = smov 64  }
  0x46   : > { %s682_s7 = smov 4   ;;  %p919_p12 = scmp.ne.s32.totalorder %s915_s22, 0 }
  0x47   : > { %468 = dma.hbm_to_vmem [thread:$0]  (!%p918_p11), %s798_s4, 128, %s800_s26, %s811_s6, %s680_s30, %s681_s24, %s682_s7  }
  0x48   : > { %183 = sbr.rel (%p919_p12) target bundleno = 519 (0x207), region = 32  ;;  %s185_s8 = sand.u32 (!%p919_p12), 1, %s660_s13  }
  0x49   : > { %s432_s9 = sshll.u32 (!%p919_p12), %s185_s8, 3  ;;  %s186_s10 = scalar_lea.sflag (!%p919_p12), [#allocation4], %s185_s8 }
  0x4a   : > { %s189_s12 = scalar_lea.vmem (!%p919_p12), [#allocation3], %s432_s9  ;;  %p920_p0 = scmp.ne.s32.totalorder (!%p919_p12), %s914_s21, 0 }
  0x4f   : > { %643 = dma.done.wait (%p920_p0), %s186_s10, 128  }
  0x50   : > { %645 = vsyncadd (%p920_p0), %s186_s10, 4294967168  ;;  %p921_p5 = scmp.ne.s32.totalorder %s913_s20, 0 }
  0x52   : > { %647 = dma.done.wait (%p921_p5), [#allocation7], 64  }
  0x53   : > { %649 = vsyncadd (%p921_p5), [#allocation7], 4294967232  ;;  %p434_p11 = scmp.ne.s32.totalorder %s668_s15, 0 }
  0x54   : > { %vm216_vm0 = vcmask (!%p434_p11), 25600   ;;  %v683_v0 = vmov (!%p434_p11), 0.0  }
  0x55   : > { %215 = sbr.rel (%p434_p11) target bundleno = 92 (0x5c), region = 44  ;;  %217 = vst.msk [vmem:[#allocation2] sm:$0x3] (!%p434_p11), %vm216_vm0, %v683_v0 }
  0x5c PF: > { %v219_v1 = vld [vmem:[%s189_s12] sm:$0xf]  ;;  %vm221_vm1 = vcmask 1043456   ;;  %v220_v2 = vld [vmem:[%s189_s12 + $0x4] sm:$0xf]  ;;  %v230_v5 = vlaneseq  ;;  %vm240_vm2 = vcmask 1041409  }
  0x5d   : > { %v222_v3 = vsel %vm221_vm1, %v219_v1, 0.0  ;;  %v225_v4 = vsel %vm221_vm1, %v220_v2, 0.0  ;;  %v218_v12 = vld [vmem:[#allocation2] sm:$0x3]  ;;  %vm244_vm3 = vcmask 25600   ;;  %p435_p4 = scmp.ne.s32.totalorder %s668_s15, 1 }
  0x5e   : > { %223 = vadd.xlane.f32.xlu0 %v222_v3  ;;  %v231_v6 = vand.u32 127, %v230_v5  ;;  %v233_v7 = vshrl.u32 %v230_v5, 7  ;;  %v251_v16 = vld [vmem:[#allocation6] sm:$0xf] (!%p435_p4)  ;;  %v684_v18 = vmov (!%p435_p4), 0.0   ;;  %vm685_vm4 = vmmov (!%p435_p4), 0  }
  0x5f   : > { %446 = vmatprep.subr.mxu0 (!%p435_p4), %v684_v18  ;;  %448 = vmatprep.mubr.msk.f32.mxu0 (!%p435_p4), %vm685_vm4, %v684_v18  ;;  %vm259_vm5 = vcmask (!%p435_p4), 31744   ;;  %v436_v19 = vld [vmem:[%s906_s2] ss:$0 sm:$0xff] (!%p435_p4) }
  0x60   : > { %v234_v9 = vsub.s32 %v231_v6, %v233_v7  ;;  %447 = vmatpush3.msk.msra.mxu0 (!%p435_p4), %vm221_vm1, %v251_v16 }
  0x62   : > { %226 = vadd.xlane.f32.xlu0 %v225_v4 }
  0xeb   : > { %v224_v8 = vpop.xlane.xlu0 %223 }
  0xec   : > { %v235_v11 = vrot.slane %v224_v8, %v234_v9 }
  0xef   : > { %v227_v10 = vpop.xlane.xlu0 %226  ;;  %249 = sbr.rel (%p435_p4) target bundleno = 494 (0x1ee), region = 48 }
  0xf0   : > { %v239_v13 = vrot.slane %v227_v10, %v234_v9 }
  0xf2   : > { %v241_v14 = vsel %vm240_vm2, %v239_v13, %v235_v11 }
  0xf3   : > { %v243_v15 = vadd.f32 %v241_v14, %v218_v12 }
  0xf5   : > { %245 = vst.msk [vmem:[#allocation2] sm:$0x3] %vm244_vm3, %v243_v15 }
  0xfc   : > { %v250_v17 = vld [vmem:[#allocation2] sm:$0x3] }
  0xfd   : > { %449 = vmatmul.mubr.msk.f32.vlgmr.msra.gmra.mrb[0].mxu0 %vm259_vm5, %v250_v17 }
 0x1d0   : > { %v332_v20 = vpop.f32.mrb[0].mxu0 }
 0x1d1   : > { %v333_v21 = vadd.f32 %v436_v19, %v332_v20  ;;  %v450_v22 = vpop.f32.mrb[1].mxu0 }
 0x1d3   : > { %v439_v23 = vmul.f32 -1.442695, %v333_v21 }
 0x1d5   : > { %530 = vpow2.f32 %v439_v23 }
 0x1df   : > { %v531_v24 = vpop.eup %530 }
 0x1e0   : > { %v339_v25 = vadd.f32 1.0, %v531_v24 }
 0x1e2   : > { %532 = vrcp.f32 %v339_v25 }
 0x1ec   : > { %v533_v26 = vpop.eup %532 }
 0x1ed   : > { %342 = vst [vmem:[#allocation8] sm:$0x3] %v533_v26 }
 0x1ee PF: > { %p860_p7 = scmp.eq.s32.totalorder %s425_s18, 1  ;;  %s686_s22 = smov [#allocation8]  }
 0x1ef   : > { %s352_s27 = sshll.u32 %s686_s22, 4  ;;  %s353_s27 = int_to_ptr.vmem [resolvable:$true] %s352_s27 }
 0x1f0   : > { %s592_s26 = scalar_lea.vmem %s353_s27, 32  ;;  %p599_p6 = scmp.lt.s32.totalorder %s353_s27, %s353_s27 }
 0x1f1   : > { %p593_p9 = scmp.ne.s32.totalorder %s353_s27, %s592_s26  ;;  %p600_p8 = scmp.lt.s32.totalorder %s592_s26, %s592_s26 }
 0x1f3   : > { %p594_p10 = pnand %p593_p9, %p860_p7  ;;  %p601_p13 = por %p600_p8, %p599_p6 }
 0x1f5   : > { %p595_p3 = pneg %p594_p10 }
 0x1f7   : > { %p602_p1 = pnand %p601_p13, %p595_p3 }
 0x1f9   : > { %605 = shalt.err (!%p602_p1)
}
 0x1fa   : > { %s606_s18 = scalar_lea.hbm %s907_s3, 32 }
 0x1fb   : > { %p607_p2 = scmp.ne.s32.totalorder %s907_s3, %s606_s18  ;;  %p612_p5 = scmp.lt.u32.totalorder %s606_s18, %s907_s3 }
 0x1fd   : > { %p608_p12 = pnand %p607_p2, %p860_p7 }
 0x1ff   : > { %p609_p0 = pneg %p608_p12 }
 0x201   : > { %p614_p11 = pnand %p612_p5, %p609_p0 }
 0x203   : > { %617 = shalt.err (!%p614_p11)
}
 0x204   : > { %458 = dma.vmem_to_hbm [thread:$0]  (%p860_p7), %s353_s27, 32, %s907_s3, [#allocation5]  }
 0x205   : > { %651 = dma.done.wait (%p860_p7), [#allocation5], 32  }
 0x206   : > { %653 = vsyncadd (%p860_p7), [#allocation5], 4294967264 }
 0x207 PF: > { %s18_s17 = sadd.s32 1, %s676_s17   ;;  %s923_s12 = smov %s660_s13 }
 0x208   : > { %p15_p4 = scmp.ge.s32.totalorder %s18_s17, 4   ;;  %s924_s13 = smov %s664_s14 }
 0x209   : > { %s925_s14 = smov %s807_s5  ;;  %s926_s15 = smov %s672_s16 }
 0x20a   : > { %s927_s16 = smov %s929_s11  ;;  %17 = sbr.rel (!%p15_p4) target bundleno = 6 (0x6), region = 82 }
 0x211   :  { %365 = vsyncpa [#allocation4], 1 }
 0x212   :  { %367 = vsyncpa [#allocation4 + $0x1], 1 }
 0x213   :  { %368 = vsyncpa [#allocation7], 1 }
 0x214   :  { %369 = vsyncpa [#allocation5], 1 }
 0x215   :  { %371 = vsyncpa [#allocation5 + $0x1], 1 }

</bundles_post_ra>
